<compile_context>
chip_gen: v6e
topology: v6e:2x2x1
jax: 0.10.0
libtpu: 0.0.40
codegen_flags: <defaults>
</compile_context>

<pallas_src>
import functools
import math

import jax
import jax.numpy as jnp
from jax.experimental import pallas as pl
from jax.experimental.pallas import tpu as pltpu


# ----------------------------- helpers ------------------------------------

def _round_up(x, m):
    return ((x + m - 1) // m) * m


def _choose_tile_rows(rows, max_tile=512):
    """Row-tile selection: as large as possible (amortize ~0.35us/step grid overhead),
    but keep >= 2 grid steps when there is enough work so the 'parallel' axis can
    shard across the two TensorCores on v7x.  VMEM use stays tiny for n_fft=64
    (double-buffered frames+out+basis < 1 MiB at 512 rows)."""
    if rows <= 8:
        return 8
    half = -(-rows // 2)                       # ceil(rows / 2)  -> >= 2 grid steps
    return min(max_tile, _round_up(half, 8))


# ----------------------------- Pallas kernel ------------------------------

def _spectrogram_kernel(frames_ref, basis_ref, out_ref, *, half_width):
    # frames_ref : (TM, n_fft)          raw frame tile (window already folded into basis)
    # basis_ref  : (n_fft, 2*half)      [ w*cos | w*(-sin) ]  zero-padded to 128-multiple cols
    # out_ref    : (TM, 2*half)         lane-dense output; cols [0, n_freq) hold |X_k|^2
    p = jnp.dot(frames_ref[...], basis_ref[...],
                preferred_element_type=jnp.float32)          # one MXU matmul -> [re | im]
    p2 = p * p                                               # VPU square
    # Fold the imaginary half onto the real half:
    #   out[:, j] = re_j^2 + im_j^2  for j < half   (XLU rotate runs in its own slot)
    out_ref[...] = p2 + pltpu.roll(p2, shift=half_width, axis=1)


def _spectrogram_matmul(frames, basis, n_freq, *, max_tile_rows=512):
    rows, n_fft = frames.shape
    width = basis.shape[1]                     # 2 * half_width, multiple of 128
    half_width = width // 2

    tile = _choose_tile_rows(rows, max_tile_rows)
    rows_p = _round_up(rows, tile)
    if rows_p != rows:
        frames = jnp.pad(frames, ((0, rows_p - rows), (0, 0)))

    grid = (rows_p // tile,)
    out = pl.pallas_call(
        functools.partial(_spectrogram_kernel, half_width=half_width),
        out_shape=jax.ShapeDtypeStruct((rows_p, width), jnp.float32),
        grid_spec=pltpu.PrefetchScalarGridSpec(
            num_scalar_prefetch=0,
            grid=grid,
            in_specs=[
                pl.BlockSpec((tile, n_fft), lambda i: (i, 0)),   # frame tile
                pl.BlockSpec((n_fft, width), lambda i: (0, 0)),  # fused basis (resident)
            ],
            out_specs=pl.BlockSpec((tile, width), lambda i: (i, 0)),
        ),
        compiler_params=pltpu.CompilerParams(
            dimension_semantics=("parallel",)),
    )(frames, basis)
    return out[:rows, :n_freq]


# ----------------------------- Module wrapper ------------------------------

class SpectrogramPallas:
    """JAX/Pallas equivalent of torchaudio.transforms.Spectrogram (power spectrogram)."""

    def __init__(self, n_fft=64, win_length=None, hop_length=None, pad=0,
                 power=2.0, normalized=False, center=True, pad_mode="reflect",
                 onesided=True):
        assert power == 2.0 and onesided and normalized is False
        self.n_fft = n_fft
        self.win_length = win_length if win_length is not None else n_fft
        self.hop_length = hop_length if hop_length is not None else self.win_length // 2
        self.pad = pad
        self.center = center
        self.pad_mode = pad_mode
        self.n_freq = n_fft // 2 + 1

        # hann_window(win_length) -- torch default is periodic=True
        n = jnp.arange(self.win_length, dtype=jnp.float32)
        win = 0.5 - 0.5 * jnp.cos(2.0 * math.pi * n / self.win_length)
        # torch.stft zero-pads the window to n_fft (centered) if win_length < n_fft
        if self.win_length < n_fft:
            left = (n_fft - self.win_length) // 2
            win = jnp.pad(win, (left, n_fft - self.win_length - left))
        self.window = win.reshape(1, n_fft)              # kept for reference / inspection

        # onesided rDFT bases: X[k] = sum_n x[n] * exp(-2i*pi*k*n/N)
        # Compute (k*n) mod N in integers before scaling -> accurate f32 angles
        # even for large n_fft.
        k = jnp.arange(self.n_freq, dtype=jnp.int32)[None, :]       # (1, n_freq)
        nn = jnp.arange(n_fft, dtype=jnp.int32)[:, None]            # (n_fft, 1)
        kn_mod = (nn * k) % n_fft
        ang = (2.0 * math.pi / n_fft) * kn_mod.astype(jnp.float32)  # (n_fft, n_freq)

        # Fold the window into the bases:  (x*w) @ C  ==  x @ (diag(w) @ C)
        cos_b = jnp.cos(ang) * win[:, None]                         # (n_fft, n_freq)
        sin_b = -jnp.sin(ang) * win[:, None]                        # imaginary-part basis

        # Fuse into one lane-dense basis: pad each half to a multiple of 64 columns,
        # concatenate -> total width is a multiple of 128 (exactly 128 for n_fft=64).
        half_w = _round_up(self.n_freq, 64)
        cos_p = jnp.pad(cos_b, ((0, 0), (0, half_w - self.n_freq)))
        sin_p = jnp.pad(sin_b, ((0, 0), (0, half_w - self.n_freq)))
        self.basis = jnp.concatenate([cos_p, sin_p], axis=1)        # (n_fft, 2*half_w)

    def __call__(self, waveform):
        # waveform: (..., time) -> (..., n_freq, n_frames)
        lead = waveform.shape[:-1]
        time = waveform.shape[-1]
        x = waveform.reshape((-1, time)).astype(jnp.float32)        # (B, time)

        if self.pad > 0:
            x = jnp.pad(x, ((0, 0), (self.pad, self.pad)))
        if self.center:
            half = self.n_fft // 2
            if x.shape[-1] < half + 1:
                raise ValueError(
                    f"reflect padding needs time >= n_fft//2 + 1 ({half + 1}), "
                    f"got {x.shape[-1]}")
            x = jnp.pad(x, ((0, 0), (half, half)), mode="reflect")

        padded_len = x.shape[-1]
        n_frames = 1 + (padded_len - self.n_fft) // self.hop_length

        # frame extraction (strided gather) — plain-JAX glue, not the hot path
        # TODO(synk): with hop == n_fft//2 the framing could be done in-kernel from a
        # contiguous waveform window to halve HBM input traffic; kept host-side here.
        frame_idx = (jnp.arange(n_frames)[:, None] * self.hop_length
                     + jnp.arange(self.n_fft)[None, :])             # (F, n_fft)
        frames = x[:, frame_idx]                                    # (B, F, n_fft)
        B = frames.shape[0]
        frames2d = frames.reshape(B * n_frames, self.n_fft)         # (rows, n_fft)

        # hot path: fused window+DFT matmul + power, in Pallas
        spec = _spectrogram_matmul(frames2d, self.basis, self.n_freq)   # (rows, n_freq)

        spec = spec.reshape(B, n_frames, self.n_freq)
        spec = jnp.transpose(spec, (0, 2, 1))                       # (B, n_freq, n_frames)
        return spec.reshape(lead + (self.n_freq, n_frames))


# --------------------------------- main ------------------------------------

if __name__ == "__main__":
    key = jax.random.PRNGKey(0)
    batch, time = 2, 256
    waveform = jax.random.normal(key, (batch, time), dtype=jnp.float32)

    transform = SpectrogramPallas(n_fft=64)          # win=64, hop=32, power=2
    out = transform(waveform)
    out = jax.block_until_ready(out)

    # sanity: expected shape (batch, n_fft//2+1, 1 + time//hop)
    expected = (batch, 64 // 2 + 1, 1 + time // 32)
    assert out.shape == expected, (out.shape, expected)

    # numerical check against a pure-JAX rFFT reference
    half = 32
    xpad = jnp.pad(waveform, ((0, 0), (half, half)), mode="reflect")
    idx = jnp.arange(expected[2])[:, None] * 32 + jnp.arange(64)[None, :]
    ref_frames = xpad[:, idx] * transform.window[0]
    ref = jnp.abs(jnp.fft.rfft(ref_frames, axis=-1)) ** 2          # (B, F, n_freq)
    ref = jnp.transpose(ref, (0, 2, 1))
    assert jnp.allclose(out, ref, rtol=1e-4, atol=1e-3), float(jnp.max(jnp.abs(out - ref)))

    print("KERNEL_OK")
</pallas_src>

<mosaic_0001>
module attributes {stable_mosaic.version = 11 : i64} {
  func.func @_spectrogram_kernel(%arg0: i32, %arg1: memref<16x64xf32, #tpu.memory_space<vmem>>, %arg2: memref<64x128xf32, #tpu.memory_space<vmem>>, %arg3: memref<16x128xf32, #tpu.memory_space<vmem>>) attributes {dimension_semantics = [#tpu.dimension_semantics<parallel>], iteration_bounds = array<i64: 2>, scalar_prefetch = 0 : i64, scratch_operands = 0 : i64, tpu.core_type = #tpu.core_type<tc>, window_params = [{transform_indices = @transform_0, window_bounds = array<i64: 16, 64>}, {pipeline_mode = #tpu.pipeline_mode<synchronous>, transform_indices = @transform_1, window_bounds = array<i64: 64, 128>}, {transform_indices = @transform_2, window_bounds = array<i64: 16, 128>}]} {
    %c0 = arith.constant 0 : index
    %c0_0 = arith.constant 0 : index
    %0 = vector.load %arg1[%c0, %c0_0] : memref<16x64xf32, #tpu.memory_space<vmem>>, vector<16x64xf32>
    %c0_1 = arith.constant 0 : index
    %c0_2 = arith.constant 0 : index
    %1 = vector.load %arg2[%c0_1, %c0_2] : memref<64x128xf32, #tpu.memory_space<vmem>>, vector<64x128xf32>
    %cst = arith.constant dense<0.000000e+00> : vector<16x128xf32>
    %2 = tpu.matmul %0, %1, %cst {dimension_numbers = #tpu.dot_dimension_numbers<[1], [0], [0], [1], [0, 0, 1, 1], [], []>} : vector<16x64xf32>, vector<64x128xf32>, vector<16x128xf32> -> vector<16x128xf32>
    %3 = arith.mulf %2, %2 : vector<16x128xf32>
    %c64_i32 = arith.constant 64 : i32
    %4 = tpu.dynamic_rotate %3 by %c64_i32 dim 1 : vector<16x128xf32>, i32 -> vector<16x128xf32>
    %5 = arith.addf %3, %4 : vector<16x128xf32>
    %c0_3 = arith.constant 0 : index
    %c0_4 = arith.constant 0 : index
    %6 = vector.load %arg3[%c0_3, %c0_4] : memref<16x128xf32, #tpu.memory_space<vmem>>, vector<16x128xf32>
    tpu.vector_store %arg3[%c0_3, %c0_4], %5 {strides = array<i32>} : memref<16x128xf32, #tpu.memory_space<vmem>>, vector<16x128xf32>,
    return
  }
  func.func @transform_0(%arg0: i32) -> (i32, i32) {
    %c0_i32 = arith.constant 0 : i32
    %c0_i32_0 = arith.constant 0 : i32
    return %arg0, %c0_i32 : i32, i32
  }
  func.func @transform_1(%arg0: i32) -> (i32, i32) {
    %c0_i32 = arith.constant 0 : i32
    %c0_i32_0 = arith.constant 0 : i32
    %c0_i32_1 = arith.constant 0 : i32
    return %c0_i32, %c0_i32_0 : i32, i32
  }
  func.func @transform_2(%arg0: i32) -> (i32, i32) {
    %c0_i32 = arith.constant 0 : i32
    %c0_i32_0 = arith.constant 0 : i32
    return %arg0, %c0_i32 : i32, i32
  }
}

</mosaic_0001>

<bundles_post_ra>
// kernel: tpu_custom_call.1
= control target key start
LH: loop header
LB: loop body
LE: loop exit
PB: predicated region body
PF: predicated region fallthrough
CT: control target
= control target key end

     0   :  { %7 = vsyncpa [#allocation3], 0  ;;  %s825_s0 = inlined_call_operand.hbm [shape: f32[32,64], index: 0, kind: input, shape index: {}]   ;;  %s826_s1 = inlined_call_operand.hbm [shape: f32[64,128], index: 1, kind: input, shape index: {}]   ;;  %s827_s2 = inlined_call_operand.hbm [shape: f32[32,128], index: 2, kind: output, shape index: {}]  }
   0x1   :  { %9 = vsyncpa [#allocation3 + $0x1], 0 }
   0x2   :  { %10 = vsyncpa [#allocation6], 0 }
   0x3   :  { %11 = vsyncpa [#allocation4], 0 }
   0x4   :  { %13 = vsyncpa [#allocation4 + $0x1], 0  ;;  %s636_s9 = smov 0   ;;  %s638_s10 = smov 0  }
   0x5   :  { %s640_s11 = smov 0   ;;  %s642_s12 = smov 0  }
   0x6 LB: > { %s657_s13 = sadd.s32 4294967295, %s611_s12   ;;  %s378_s14 = sadd.s32 4294967294, %s611_s12   ;;  %s611_s12 = sphi %s642_s12, %s849_s12   ;;  %s607_s11 = sphi %s640_s11, %s848_s11   ;;  %s603_s10 = sphi %s638_s10, %s847_s10   ;;  %s599_s9 = sphi %s636_s9, %s846_s9  }
   0x7   : > { %p39_p0 = scmp.ne.s32.totalorder %s603_s10, %s599_s9  ;;  %p828_p1 = scmp.eq.s32.totalorder %s657_s13, 0 }
   0x8   : > { %p90_p3 = scmp.eq.s32.totalorder %s378_s14, 1  ;;  %p379_p5 = scmp.ge.s32.totalorder %s611_s12, 1 }
   0x9   : > { %p666_p4 = por %p828_p1, %p39_p0  ;;  %p97_p7 = scmp.lt.s32.totalorder %s611_s12, 3 }
   0xa   : > { %p671_p6 = por %p90_p3, %p39_p0  ;;  %s613_s18 = smov [#allocation5]  }
   0xb   : > { %s832_s15 = scalar_select %p666_p4, 1, 0 }
   0xc   : > { %s833_s16 = scalar_select %p671_p6, 1, 0 }
   0xd   : > { %p676_p8 = pnand %p379_p5, %p97_p7  ;;  %s109_s19 = sshll.u32 %s613_s18, 4  ;;  %s110_s19 = int_to_ptr.vmem [resolvable:$true] %s109_s19 }
   0xe   : > { %s690_s21 = sadd.s32 1, %s611_s12   ;;  %s26_s22 = sadd.s32 1, %s607_s11 }
   0xf   : > { %s834_s17 = scalar_select %p676_p8, 1, 0 }
  0x10   : > { %p435_p9 = pneg %p676_p8  ;;  %s23_s23 = ssub.s32 %s611_s12, %s690_s21 }
  0x11   : > { %s500_s24 = scalar_lea.vmem %s110_s19, 1024  ;;  %p508_p5 = scmp.lt.s32.totalorder %s110_s19, %s110_s19 }
  0x12   : > { %p685_p11 = pnand %p435_p9, %p828_p1  ;;  %p501_p13 = scmp.ne.s32.totalorder %s110_s19, %s500_s24 }
  0x13   : > { %p509_p7 = scmp.lt.s32.totalorder %s500_s24, %s500_s24 }
  0x14   : > { %p491_p12 = pneg %p685_p11 }
  0x15   : > { %p510_p10 = por %p509_p7, %p508_p5 }
  0x16   : > { %p503_p0 = pnand %p501_p13, %p491_p12 }
  0x18   : > { %p504_p3 = pneg %p503_p0 }
  0x1a   : > { %p511_p2 = pnand %p510_p10, %p504_p3 }
  0x1c   : > { %514 = shalt.err (!%p511_p2)
}
  0x1d   : > { %s614_s25 = smov 128   ;;  %s615_s26 = smov 8  }
  0x1e   : > { %438 = dma.hbm_to_vmem [thread:$0]  (!%p685_p11), %s826_s1, 1024, %s110_s19, [#allocation6], %s614_s25, %s614_s25, %s615_s26  }
  0x1f   : > { %p24_p2 = scmp.eq.s32.totalorder %s23_s23, 0  ;;  %p33_p9 = scmp.ne.s32.totalorder %s607_s11, %s603_s10 }
  0x20   : > { %p34_p10 = scmp.eq.s32.totalorder %s611_s12, 0  ;;  %p448_p12 = scmp.lt.s32.totalorder %s611_s12, 2 }
  0x21   : > { %s710_s29 = scalar_select %p24_p2, %s607_s11, %s26_s22  }
  0x22   : > { %p35_p13 = por %p34_p10, %p33_p9  ;;  %p836_p0 = scmp.eq.s32.totalorder %s657_s13, 1 }
  0x23   : > { %s123_s3 = sand.u32 1, %s607_s11   ;;  %s396_s4 = sshll.u32 %s611_s12, 8 }
  0x24   : > { %p714_p3 = por %p836_p0, %p33_p9  ;;  %s382_s5 = sshll.u32 %s123_s3, 4 }
  0x25   : > { %s723_s8 = scalar_lea.hbm %s825_s0, %s396_s4  ;;  %s127_s14 = scalar_lea.vmem [#allocation2], %s382_s5 }
  0x26   : > { %s837_s30 = scalar_select %p714_p3, 1, 0 }
  0x27   : > { %s134_s18 = sshll.u32 %s127_s14, 4  ;;  %p725_p11 = pnand %p448_p12, %p35_p13  ;;  %s729_s18 = int_to_ptr.vmem [resolvable:$true] %s134_s18 }
  0x28   : > { %s731_s20 = scalar_lea.sflag [#allocation3], %s123_s3  ;;  %s515_s22 = scalar_lea.hbm %s723_s8, 256 }
  0x29   : > { %p516_p5 = scmp.ne.s32.totalorder %s723_s8, %s515_s22  ;;  %p517_p7 = pneg %p725_p11 }
  0x2a   : > { %s520_s27 = scalar_lea.hbm %s825_s0, 512  ;;  %p521_p10 = scmp.lt.s32.totalorder %s723_s8, %s825_s0 }
  0x2b   : > { %p518_p2 = pnand %p517_p7, %p516_p5  ;;  %p522_p12 = scmp.lt.s32.totalorder %s520_s27, %s515_s22 }
  0x2d   : > { %p519_p9 = pneg %p518_p2  ;;  %p523_p13 = por %p522_p12, %p521_p10 }
  0x2f   : > { %p524_p0 = pnand %p523_p13, %p519_p9 }
  0x31   : > { %527 = shalt.err (!%p524_p0)
}
  0x32   : > { %s528_s3 = scalar_lea.vmem %s729_s18, 256  ;;  %s616_s5 = smov [#allocation2]  }
  0x33   : > { %p529_p1 = scmp.ne.s32.totalorder %s729_s18, %s528_s3  ;;  %s533_s6 = sshll.u32 %s616_s5, 4  ;;  %s534_s6 = int_to_ptr.vmem [resolvable:$false] %s533_s6 }
  0x34   : > { %s535_s7 = scalar_lea.vmem %s534_s6, 512  ;;  %p536_p2 = scmp.lt.s32.totalorder %s729_s18, %s534_s6 }
  0x35   : > { %p531_p6 = pnand %p529_p1, %p517_p7  ;;  %p537_p3 = scmp.lt.s32.totalorder %s535_s7, %s528_s3 }
  0x37   : > { %p532_p5 = pneg %p531_p6  ;;  %p538_p4 = por %p537_p3, %p536_p2 }
  0x39   : > { %p539_p8 = pnand %p538_p4, %p532_p5 }
  0x3b   : > { %542 = shalt.err (!%p539_p8)
}
  0x3c   : > { %442 = dma.hbm_to_vmem [thread:$0]  (!%p725_p11), %s723_s8, 256, %s729_s18, %s731_s20, %s614_s25, %s614_s25, %s615_s26  }
  0x3d   : > { %p839_p1 = scmp.ne.s32.totalorder %s834_s17, 0 }
  0x3e   : > { %s758_s14 = sand.u32 (!%p839_p1), 1, %s603_s10   ;;  %p840_p4 = scmp.ne.s32.totalorder (!%p839_p1), %s832_s15, 0 }
  0x3f   : > { %146 = sbr.rel (%p839_p1) target bundleno = 421 (0x1a5), region = 28  ;;  %s386_s22 = sshll.u32 (!%p839_p1), %s758_s14, 4 }
  0x40   : > { %s149_s23 = scalar_lea.sflag (!%p839_p1), [#allocation3], %s758_s14  ;;  %s152_s19 = scalar_lea.vmem (!%p839_p1), [#allocation2], %s386_s22 }
  0x44   : > { %586 = dma.done.wait (%p840_p4), %s149_s23, 256  }
  0x45   : > { %588 = vsyncadd (%p840_p4), %s149_s23, 4294967040  ;;  %p841_p6 = scmp.eq.s32.totalorder %s657_s13, 0 }
  0x47   : > { %590 = dma.done.wait (%p841_p6), [#allocation6], 1024   ;;  %p842_p8 = pmov %p841_p6 }
  0x48   : > { %v188_v0 = vld [vmem:[#allocation5 + $0x38] sm:$0xff]  ;;  %v187_v1 = vld [vmem:[#allocation5 + $0x30] sm:$0xff]  ;;  %vm189_vm0 = vcmask 523264   ;;  %v186_v2 = vld [vmem:[#allocation5 + $0x28] sm:$0xff]  ;;  %s617_s15 = smov 64   ;;  %s176_s17 = scalar_lea.vmem [#allocation7], %s386_s22 }
  0x49   : > { %592 = vsyncadd (%p842_p8), [#allocation6], 4294966272  ;;  %408 = vmatprep.subr.mxu0 %v188_v0  ;;  %v179_v3 = vld [vmem:[%s152_s19] sm:$0xff]  ;;  %v184_v5 = vld [vmem:[#allocation5 + $0x18] sm:$0xff]  ;;  %s295_s25 = sshll.u32 %s176_s17, 4  ;;  %s397_s26 = sshll.u32 %s657_s13, 8  ;;  %s777_s25 = int_to_ptr.vmem [resolvable:$true] %s295_s25 }
  0x4a   : > { %409 = vmatpush3.msra.mxu0 %v188_v0  ;;  %424 = vmatprep.mubr.msk.f32.mxu0 %vm189_vm0, %v179_v3  ;;  %v185_v4 = vld [vmem:[#allocation5 + $0x20] sm:$0xff]  ;;  %v183_v6 = vld [vmem:[#allocation5 + $0x10] sm:$0xff]  ;;  %v182_v7 = vld [vmem:[#allocation5 + $0x8] sm:$0xff]  ;;  %s782_s20 = scalar_lea.hbm %s827_s2, %s397_s26  ;;  %s282_s24 = scalar_lea.sflag [#allocation4], %s758_s14 }
  0x4b   : > { %410 = vmatprep.subr.mxu0 %v187_v1  ;;  %v181_v8 = vld [vmem:[#allocation5] sm:$0xff]  ;;  %v180_v9 = vld [vmem:[%s152_s19 + $0x8] sm:$0xff]  ;;  %s543_s27 = scalar_lea.vmem %s777_s25, 256  ;;  %p843_p11 = scmp.ne.s32.totalorder %s837_s30, 0 }
  0x4c   : > { %411 = vmatpush3.msra.mxu0 %v187_v1  ;;  %p544_p3 = scmp.ne.s32.totalorder %s777_s25, %s543_s27  ;;  %s618_s13 = smov [#allocation7]  }
  0x4d   : > { %412 = vmatprep.subr.mxu0 %v186_v2  ;;  %s547_s28 = sshll.u32 %s618_s13, 4  ;;  %s548_s28 = int_to_ptr.vmem [resolvable:$false] %s547_s28 }
  0x4e   : > { %413 = vmatpush3.msra.mxu0 %v186_v2  ;;  %p545_p7 = pnand %p544_p3, %p843_p11  ;;  %s549_s4 = scalar_lea.vmem %s548_s28, 512 }
  0x4f   : > { %414 = vmatprep.subr.mxu0 %v185_v4  ;;  %p550_p10 = scmp.lt.s32.totalorder %s777_s25, %s548_s28  ;;  %p551_p12 = scmp.lt.s32.totalorder %s549_s4, %s543_s27 }
  0x50   : > { %415 = vmatpush3.msra.mxu0 %v185_v4  ;;  %p546_p9 = pneg %p545_p7 }
  0x51   : > { %416 = vmatprep.subr.mxu0 %v184_v5  ;;  %p552_p13 = por %p551_p12, %p550_p10 }
  0x52   : > { %417 = vmatpush3.msra.mxu0 %v184_v5 }
  0x53   : > { %418 = vmatprep.subr.mxu0 %v183_v6  ;;  %p553_p0 = pnand %p552_p13, %p546_p9 }
  0x54   : > { %419 = vmatpush3.msra.mxu0 %v183_v6 }
  0x55   : > { %420 = vmatprep.subr.mxu0 %v182_v7 }
  0x56   : > { %421 = vmatpush3.msra.mxu0 %v182_v7 }
  0x57   : > { %422 = vmatprep.subr.mxu0 %v181_v8 }
  0x58   : > { %423 = vmatpush3.msra.mxu0 %v181_v8 }
  0x59   : > { %425 = vmatmul.mubr.msk.f32.vlgmr.msra.gmra.mxu0 %vm189_vm0, %v180_v9 }
 0x119   : > { %v426_v10 = vpop.f32.mrf.mxu0 }
 0x11a   : > { %v272_v13 = vmul.f32 %v426_v10, %v426_v10 }
 0x11b   : > { %v262_v11 = vpop.f32.mrf.mxu0 }
 0x11c   : > { %v271_v12 = vmul.f32 %v262_v11, %v262_v11 }
 0x11e   : > { %273 = vrot.lane.b32.xlu0 %v271_v12, %s617_s15 }
 0x122   : > { %275 = vrot.lane.b32.xlu0 %v272_v13, %s617_s15 }
 0x190   : > { %v274_v14 = vpop.permute.xlu0 %273 }
 0x191   : > { %v277_v15 = vadd.f32 %v274_v14, %v271_v12 }
 0x193   : > { %279 = vst [vmem:[%s176_s17] sm:$0xff] %v277_v15 }
 0x194   : > { %v276_v16 = vpop.permute.xlu0 %275 }
 0x195   : > { %v278_v17 = vadd.f32 %v276_v16, %v272_v13 }
 0x197   : > { %280 = vst [vmem:[%s176_s17 + $0x8] sm:$0xff] %v278_v17 }
 0x198   : > { %556 = shalt.err (!%p553_p0)
}
 0x199   : > { %s557_s3 = scalar_lea.hbm %s782_s20, 256  ;;  %s561_s7 = scalar_lea.hbm %s827_s2, 512 }
 0x19a   : > { %p558_p5 = scmp.ne.s32.totalorder %s782_s20, %s557_s3  ;;  %p562_p4 = scmp.lt.s32.totalorder %s782_s20, %s827_s2 }
 0x19b   : > { %p563_p6 = scmp.lt.s32.totalorder %s561_s7, %s557_s3 }
 0x19c   : > { %p559_p2 = pnand %p558_p5, %p843_p11 }
 0x19d   : > { %p564_p8 = por %p563_p6, %p562_p4 }
 0x19e   : > { %p560_p1 = pneg %p559_p2 }
 0x1a0   : > { %p565_p3 = pnand %p564_p8, %p560_p1 }
 0x1a2   : > { %568 = shalt.err (!%p565_p3)
}
 0x1a3   : > { %s619_s19 = smov 128   ;;  %s620_s15 = smov 8  }
 0x1a4   : > { %433 = dma.vmem_to_hbm [thread:$0]  (%p843_p11), %s777_s25, 256, %s782_s20, %s282_s24, %s619_s19, %s619_s19, %s620_s15  }
 0x1a5 PF: > { %s310_s17 = sand.u32 1, %s599_s9   ;;  %p844_p7 = scmp.ne.s32.totalorder %s833_s16, 0 }
 0x1a6   : > { %p845_p9 = scmp.ge.s32.totalorder %s611_s12, 2  ;;  %s311_s26 = scalar_lea.sflag [#allocation4], %s310_s17 }
 0x1a8   : > { %p444_p10 = pnand %p845_p9, %p844_p7 }
 0x1aa   : > { %p445_p12 = pneg %p444_p10 }
 0x1ac   : > { %594 = dma.done.wait (%p445_p12), %s311_s26, 256  }
 0x1ad   : > { %596 = vsyncadd (%p445_p12), %s311_s26, 4294967040  ;;  %p16_p13 = scmp.ge.s32.totalorder %s690_s21, 4   ;;  %s846_s9 = smov %s603_s10 }
 0x1ae   : > { %s847_s10 = smov %s607_s11  ;;  %s848_s11 = smov %s710_s29 }
 0x1af   : > { %s849_s12 = smov %s690_s21  ;;  %18 = sbr.rel (!%p16_p13) target bundleno = 6 (0x6), region = 77 }
 0x1b4   :  { %316 = vsyncpa [#allocation3], 1 }
 0x1b5   :  { %318 = vsyncpa [#allocation3 + $0x1], 1 }
 0x1b6   :  { %319 = vsyncpa [#allocation6], 1 }
 0x1b7   :  { %320 = vsyncpa [#allocation4], 1 }
 0x1b8   :  { %322 = vsyncpa [#allocation4 + $0x1], 1 }

</bundles_post_ra>
